<compile_context>
chip_gen: v7x
topology: tpu7x:2x2x1
jax: 0.10.0
libtpu: 0.0.40
codegen_flags: <defaults>
</compile_context>

<pallas_src>
import jax
import jax.numpy as jnp
from jax.experimental import pallas as pl
from jax.experimental.pallas import tpu as pltpu


LANES = 128
MAX_ROW_TILE = 8192        # 8192 x 128 x 4B = 4 MiB per f32 block
TINY_ROWS = 256            # below this a single full-extent block is cheapest
MIN_GRID_STEPS = 8         # keep the DMA pipeline busy / both v7x TCs fed
VMEM_LIMIT_BYTES = 48 << 20  # in+out double-buffered (<=16 MiB) + temporaries;
                             # raises v5e's 16 MiB scoped default, < v7x's 64 MiB


def _round_up(x, m):
    return ((x + m - 1) // m) * m


def _horner(xf, coef):
    """Shared numerator/denominator math. `coef` may be an array or SMEM ref."""
    p0, p1, p2, p3, q0, q1, q2 = (coef[i] for i in range(7))
    num = p0 + xf * (p1 + xf * (p2 + xf * p3))
    den = 1.0 + jnp.abs(xf * (q0 + xf * (q1 + xf * q2)))
    return num, den


def _rational_kernel(coef_ref, x_ref, o_ref):
    # coef_ref: SMEM f32[7] = [p0, p1, p2, p3, q0, q1, q2]
    # x_ref / o_ref: VMEM [row_tile, 128] blocks in the input's dtype.
    x = x_ref[...].astype(jnp.float32)
    num, den = _horner(x, coef_ref)
    # EUP approx reciprocal (otherwise-idle slot) + one Newton step: ~f32
    # accuracy while trimming the VALU refinement ops of an exact divide.
    r = pl.reciprocal(den, approx=True)
    r = r * (2.0 - den * r)
    o_ref[...] = (num * r).astype(o_ref.dtype)


def _rational_2d(x2d, coef):
    """Run the Pallas kernel on a lane-dense (rows, 128) slab."""
    rows, _ = x2d.shape
    if rows <= TINY_ROWS:
        row_tile = rows                       # single full-extent block
    else:
        # >= ~MIN_GRID_STEPS steps for pipelining / megacore sharding; tile is
        # a multiple of 32 sublanes (valid for f32 / bf16 / 8-bit inputs) and
        # capped at 4 MiB f32 blocks.
        row_tile = min(MAX_ROW_TILE,
                       _round_up(pl.cdiv(rows, MIN_GRID_STEPS), 32))
    grid = (pl.cdiv(rows, row_tile),)

    return pl.pallas_call(
        _rational_kernel,
        out_shape=jax.ShapeDtypeStruct(x2d.shape, x2d.dtype),
        grid_spec=pltpu.PrefetchScalarGridSpec(
            num_scalar_prefetch=0,
            grid=grid,
            in_specs=[
                pl.BlockSpec(memory_space=pltpu.MemorySpace.SMEM),  # coefficients
                pl.BlockSpec((row_tile, LANES), lambda i: (i, 0)),
            ],
            out_specs=pl.BlockSpec((row_tile, LANES), lambda i: (i, 0)),
        ),
        compiler_params=pltpu.CompilerParams(
            dimension_semantics=("parallel",),
            vmem_limit_bytes=VMEM_LIMIT_BYTES,
        ),
    )(coef, x2d)


def rational_activation(x, p, q):
    """Apply the learnable rational activation elementwise.

    x: any shape / float dtype (e.g. NCHW), p: (4,), q: (3,).
    Returns an array with the same shape and dtype as x.
    """
    orig_shape = x.shape
    dtype = x.dtype
    coef = jnp.concatenate([
        jnp.asarray(p, jnp.float32).reshape(-1),
        jnp.asarray(q, jnp.float32).reshape(-1),
    ])

    xf = x.reshape(-1)
    n = xf.shape[0]
    rem = n % LANES
    main = n - rem

    if main == 0:
        # Fewer than 128 elements: plain jnp is cheaper than launching a kernel.
        num, den = _horner(xf.astype(jnp.float32), coef)
        return (num / den).astype(dtype).reshape(orig_shape)

    main_out = _rational_2d(xf[:main].reshape(-1, LANES), coef)

    if rem == 0:
        return main_out.reshape(orig_shape)

    # <128-element tail handled with plain jnp; avoids the full-array
    # pad + slice HBM round-trips of the previous version.
    num, den = _horner(xf[main:].astype(jnp.float32), coef)
    tail_out = (num / den).astype(dtype)
    return jnp.concatenate([main_out.reshape(-1), tail_out]).reshape(orig_shape)


def _reference(x, p, q):
    xf = x.astype(jnp.float32)
    num = p[0] + p[1] * xf + p[2] * xf**2 + p[3] * xf**3
    den = 1.0 + jnp.abs(q[0] * xf + q[1] * xf**2 + q[2] * xf**3)
    return (num / den).astype(x.dtype)


if __name__ == "__main__":
    key = jax.random.PRNGKey(0)
    kx, kp, kq, kx2, kx3 = jax.random.split(key, 5)

    # Parameter init as in the module's __init__, plus a small perturbation so
    # every polynomial term is exercised.
    p = jnp.array([1.0, 0.0, 0.0, 0.0], jnp.float32) + \
        0.1 * jax.random.normal(kp, (4,), jnp.float32)
    q = jnp.array([1.0, 0.0, 0.0], jnp.float32) + \
        0.1 * jax.random.normal(kq, (3,), jnp.float32)

    # Case 1: lane-aligned NCHW f32 input (single full-extent block path).
    x = jax.random.normal(kx, (2, 4, 16, 16), jnp.float32)
    out = jax.block_until_ready(rational_activation(x, p, q))
    ref = _reference(x, p, q)
    assert out.shape == x.shape and out.dtype == x.dtype
    assert jnp.allclose(out, ref, atol=1e-4, rtol=1e-4), \
        f"max err {jnp.max(jnp.abs(out - ref))}"

    # Case 2: bf16 input — bf16 HBM traffic, f32 math inside the kernel.
    xb = x.astype(jnp.bfloat16)
    outb = jax.block_until_ready(rational_activation(xb, p, q))
    refb = _reference(xb, p, q)
    assert outb.shape == xb.shape and outb.dtype == jnp.bfloat16
    assert jnp.allclose(outb.astype(jnp.float32), refb.astype(jnp.float32),
                        atol=2e-2, rtol=2e-2)

    # Case 3: non-128-aligned element count -> aligned-prefix kernel + jnp tail.
    x3 = jax.random.normal(kx2, (3, 5, 7, 11), jnp.float32)
    out3 = jax.block_until_ready(rational_activation(x3, p, q))
    ref3 = _reference(x3, p, q)
    assert out3.shape == x3.shape and out3.dtype == x3.dtype
    assert jnp.allclose(out3, ref3, atol=1e-4, rtol=1e-4), \
        f"max err {jnp.max(jnp.abs(out3 - ref3))}"

    # Case 4: medium activation -> multi-step parallel (pipelined) grid.
    x4 = jax.random.normal(kx3, (8, 8, 64, 64), jnp.float32)  # 2048 rows of 128
    out4 = jax.block_until_ready(rational_activation(x4, p, q))
    ref4 = _reference(x4, p, q)
    assert jnp.allclose(out4, ref4, atol=1e-4, rtol=1e-4), \
        f"max err {jnp.max(jnp.abs(out4 - ref4))}"

    print("KERNEL_OK")
</pallas_src>

<mosaic_0001>
module attributes {stable_mosaic.version = 11 : i64} {
  func.func @_rational_kernel(%arg0: i32, %arg1: memref<7xf32, #tpu.memory_space<smem>>, %arg2: memref<16x128xf32, #tpu.memory_space<vmem>>, %arg3: memref<16x128xf32, #tpu.memory_space<vmem>>) attributes {dimension_semantics = [#tpu.dimension_semantics<parallel>], iteration_bounds = array<i64: 1>, scalar_prefetch = 0 : i64, scratch_operands = 0 : i64, tpu.core_type = #tpu.core_type<tc>, window_params = [{transform_indices = @transform_0, window_bounds = array<i64: 7>}, {transform_indices = @transform_1, window_bounds = array<i64: 16, 128>}, {transform_indices = @transform_2, window_bounds = array<i64: 16, 128>}]} {
    %c0 = arith.constant 0 : index
    %c0_0 = arith.constant 0 : index
    %0 = vector.load %arg2[%c0, %c0_0] : memref<16x128xf32, #tpu.memory_space<vmem>>, vector<16x128xf32>
    %c0_1 = arith.constant 0 : index
    %1 = memref.load %arg1[%c0_1] : memref<7xf32, #tpu.memory_space<smem>>
    %c1 = arith.constant 1 : index
    %2 = memref.load %arg1[%c1] : memref<7xf32, #tpu.memory_space<smem>>
    %c2 = arith.constant 2 : index
    %3 = memref.load %arg1[%c2] : memref<7xf32, #tpu.memory_space<smem>>
    %c3 = arith.constant 3 : index
    %4 = memref.load %arg1[%c3] : memref<7xf32, #tpu.memory_space<smem>>
    %c4 = arith.constant 4 : index
    %5 = memref.load %arg1[%c4] : memref<7xf32, #tpu.memory_space<smem>>
    %c5 = arith.constant 5 : index
    %6 = memref.load %arg1[%c5] : memref<7xf32, #tpu.memory_space<smem>>
    %c6 = arith.constant 6 : index
    %7 = memref.load %arg1[%c6] : memref<7xf32, #tpu.memory_space<smem>>
    %8 = vector.broadcast %4 : f32 to vector<16x128xf32>
    %9 = arith.mulf %0, %8 : vector<16x128xf32>
    %10 = vector.broadcast %3 : f32 to vector<16x128xf32>
    %11 = arith.addf %10, %9 : vector<16x128xf32>
    %12 = arith.mulf %0, %11 : vector<16x128xf32>
    %13 = vector.broadcast %2 : f32 to vector<16x128xf32>
    %14 = arith.addf %13, %12 : vector<16x128xf32>
    %15 = arith.mulf %0, %14 : vector<16x128xf32>
    %16 = vector.broadcast %1 : f32 to vector<16x128xf32>
    %17 = arith.addf %16, %15 : vector<16x128xf32>
    %18 = vector.broadcast %7 : f32 to vector<16x128xf32>
    %19 = arith.mulf %0, %18 : vector<16x128xf32>
    %20 = vector.broadcast %6 : f32 to vector<16x128xf32>
    %21 = arith.addf %20, %19 : vector<16x128xf32>
    %22 = arith.mulf %0, %21 : vector<16x128xf32>
    %23 = vector.broadcast %5 : f32 to vector<16x128xf32>
    %24 = arith.addf %23, %22 : vector<16x128xf32>
    %25 = arith.mulf %0, %24 : vector<16x128xf32>
    %26 = math.absf %25 : vector<16x128xf32>
    %cst = arith.constant 1.000000e+00 : f32
    %27 = vector.broadcast %cst : f32 to vector<16x128xf32>
    %28 = arith.addf %27, %26 : vector<16x128xf32>
    %29 = tpu.reciprocal %28 {approx = true} : vector<16x128xf32> -> vector<16x128xf32>
    %30 = arith.mulf %28, %29 : vector<16x128xf32>
    %cst_2 = arith.constant 2.000000e+00 : f32
    %31 = vector.broadcast %cst_2 : f32 to vector<16x128xf32>
    %32 = arith.subf %31, %30 : vector<16x128xf32>
    %33 = arith.mulf %29, %32 : vector<16x128xf32>
    %34 = arith.mulf %17, %33 : vector<16x128xf32>
    %c0_3 = arith.constant 0 : index
    %c0_4 = arith.constant 0 : index
    %35 = vector.load %arg3[%c0_3, %c0_4] : memref<16x128xf32, #tpu.memory_space<vmem>>, vector<16x128xf32>
    tpu.vector_store %arg3[%c0_3, %c0_4], %34 {strides = array<i32>} : memref<16x128xf32, #tpu.memory_space<vmem>>, vector<16x128xf32>,
    return
  }
  func.func @transform_0(%arg0: i32) -> i32 {
    %c0_i32 = arith.constant 0 : i32
    %c0_i32_0 = arith.constant 0 : i32
    return %c0_i32 : i32
  }
  func.func @transform_1(%arg0: i32) -> (i32, i32) {
    %c0_i32 = arith.constant 0 : i32
    %c0_i32_0 = arith.constant 0 : i32
    return %arg0, %c0_i32 : i32, i32
  }
  func.func @transform_2(%arg0: i32) -> (i32, i32) {
    %c0_i32 = arith.constant 0 : i32
    %c0_i32_0 = arith.constant 0 : i32
    return %arg0, %c0_i32 : i32, i32
  }
}

</mosaic_0001>

<bundles_post_ra>
// kernel: tpu_custom_call.1
= control target key start
LH: loop header
LB: loop body
LE: loop exit
PB: predicated region body
PF: predicated region fallthrough
CT: control target
= control target key end

     0   :  { %7 = vsyncpa [#allocation5], 0  ;;  %s246_s0 = inlined_call_operand.hbm [shape: f32[7], index: 0, kind: input, shape index: {}]   ;;  %s247_s1 = inlined_call_operand.hbm [shape: f32[16,128], index: 1, kind: input, shape index: {}]   ;;  %s248_s2 = inlined_call_operand.hbm [shape: f32[16,128], index: 2, kind: output, shape index: {}]  }
   0x1   :  { %8 = vsyncpa [#allocation3], 0 }
   0x2   :  { %9 = vsyncpa [#allocation4], 0  ;;  %s124_s11 = scalar_lea.hbm %s246_s0, 16 }
   0x3   :  { %p125_p0 = scmp.ne.s32.totalorder %s246_s0, %s124_s11  ;;  %p128_p1 = scmp.lt.u32.totalorder %s124_s11, %s246_s0 }
   0x5   :  { %p130_p2 = pnand %p128_p1, %p125_p0 }
   0x7   :  { %133 = shalt.err (!%p130_p2)
}
   0x8   :  { %s184_s16 = smov [#allocation2]   ;;  %s185_s19 = smov [#allocation6]  }
   0x9   :  { %17 = dma.hbm_to_smem %s246_s0, 16, %s184_s16, [#allocation5]  }
   0xa   :  { %s23_s20 = sshll.u32 %s185_s19, 4  ;;  %s134_s23 = scalar_lea.hbm %s247_s1, 256  ;;  %s24_s20 = int_to_ptr.vmem [resolvable:$true] %s23_s20 }
   0xb   :  { %p135_p3 = scmp.ne.s32.totalorder %s247_s1, %s134_s23  ;;  %p138_p4 = scmp.lt.u32.totalorder %s134_s23, %s247_s1 }
   0xd   :  { %p140_p5 = pnand %p138_p4, %p135_p3 }
   0xf   :  { %143 = shalt.err (!%p140_p5)
}
  0x10   :  { %s144_s28 = scalar_lea.vmem %s24_s20, 256  ;;  %p149_p7 = scmp.lt.s32.totalorder %s24_s20, %s24_s20 }
  0x11   :  { %p145_p6 = scmp.ne.s32.totalorder %s24_s20, %s144_s28  ;;  %p150_p8 = scmp.lt.s32.totalorder %s144_s28, %s144_s28 }
  0x13   :  { %p151_p9 = por %p150_p8, %p149_p7 }
  0x15   :  { %p152_p10 = pnand %p151_p9, %p145_p6 }
  0x17   :  { %155 = shalt.err (!%p152_p10)
}
  0x18   :  { %s186_s0 = smov 128   ;;  %s187_s29 = smov 8  }
  0x19   :  { %29 = dma.hbm_to_vmem [thread:$0]  %s247_s1, 256, %s24_s20, [#allocation3], %s186_s0, %s186_s0, %s187_s29  }
  0x1a   :  { %178 = dma.done.wait [#allocation5], 16  }
  0x1b   :  { %179 = vsyncadd [#allocation5], 4294967280 }
  0x1c   :  { %180 = dma.done.wait [#allocation3], 256  }
  0x1d   :  { %181 = vsyncadd [#allocation3], 4294967040 }
  0x1e   :  { %36 = sfence }
  0x1f   :  { %s113_s4 = sld [smem:[#allocation2 + $0x5]]  ;;  %s114_s5 = sld [smem:[#allocation2 + $0x6]]  ;;  %v37_v0 = vld [vmem:[#allocation6] sm:$0xff]  ;;  %v38_v1 = vld [vmem:[#allocation6 + $0x8] sm:$0xff] }
  0x20   :  { %s112_s6 = sld [smem:[#allocation2 + $0x4]]  ;;  %s111_s7 = sld [smem:[#allocation2 + $0x3]] }
  0x21   :  { %s110_s8 = sld [smem:[#allocation2 + $0x2]]  ;;  %s109_s1 = sld [smem:[#allocation2 + $0x1]] }
  0x22   :  { %s39_s9 = sld [smem:[#allocation2]]  ;;  %s188_s10 = smov [#allocation7]  }
  0x23   :  { %s96_s11 = sshll.u32 %s188_s10, 4  ;;  %s97_s11 = int_to_ptr.vmem [resolvable:$true] %s96_s11 }
  0x24   :  { %s156_s12 = scalar_lea.vmem %s97_s11, 256  ;;  %p161_p12 = scmp.lt.s32.totalorder %s97_s11, %s97_s11 }
  0x25   :  { %v62_v2 = vstv %s114_s5  ;;  %v65_v3 = vstv %s113_s4  ;;  %p157_p11 = scmp.ne.s32.totalorder %s97_s11, %s156_s12  ;;  %p162_p13 = scmp.lt.s32.totalorder %s156_s12, %s156_s12 }
  0x26   :  { %v63_v4 = vmul.f32 %v62_v2, %v37_v0  ;;  %v64_v5 = vmul.f32 %v62_v2, %v38_v1  ;;  %v70_v8 = vstv %s112_s6  ;;  %v46_v9 = vstv %s111_s7 }
  0x27   :  { %v47_v14 = vmul.f32 %v46_v9, %v37_v0  ;;  %v49_v15 = vstv %s110_s8  ;;  %v48_v17 = vmul.f32 %v46_v9, %v38_v1  ;;  %v54_v26 = vstv %s109_s1  ;;  %p163_p0 = por %p162_p13, %p161_p12 }
  0x28   :  { %v66_v6 = vadd.f32 %v65_v3, %v63_v4  ;;  %v67_v7 = vadd.f32 %v65_v3, %v64_v5  ;;  %v59_v32 = vstv %s39_s9 }
  0x29   :  { %v50_v21 = vadd.f32 %v49_v15, %v47_v14  ;;  %v51_v23 = vadd.f32 %v49_v15, %v48_v17  ;;  %p164_p1 = pnand %p163_p0, %p157_p11 }
  0x2a   :  { %v68_v10 = vmul.f32 %v66_v6, %v37_v0  ;;  %v69_v11 = vmul.f32 %v67_v7, %v38_v1 }
  0x2b   :  { %v52_v25 = vmul.f32 %v50_v21, %v37_v0  ;;  %v53_v27 = vmul.f32 %v51_v23, %v38_v1 }
  0x2c   :  { %v71_v12 = vadd.f32 %v70_v8, %v68_v10  ;;  %v72_v13 = vadd.f32 %v70_v8, %v69_v11 }
  0x2d   :  { %v55_v28 = vadd.f32 %v54_v26, %v52_v25  ;;  %v56_v29 = vadd.f32 %v54_v26, %v53_v27 }
  0x2e   :  { %v73_v16 = vmul.f32 %v71_v12, %v37_v0  ;;  %v74_v18 = vmul.f32 %v72_v13, %v38_v1 }
  0x2f   :  { %v57_v30 = vmul.f32 %v55_v28, %v37_v0  ;;  %v58_v33 = vmul.f32 %v56_v29, %v38_v1 }
  0x30   :  { %v75_v19 = vand.u32 2147483647, %v73_v16  ;;  %v76_v20 = vand.u32 2147483647, %v74_v18 }
  0x31   :  { %v60_v37 = vadd.f32 %v59_v32, %v57_v30  ;;  %v61_v39 = vadd.f32 %v59_v32, %v58_v33 }
  0x32   :  { %v77_v22 = vadd.f32 1.0, %v75_v19  ;;  %v78_v24 = vadd.f32 1.0, %v76_v20 }
  0x34   :  { %120 = vrcp.f32 %v77_v22 }
  0x35   :  { %122 = vrcp.f32 %v78_v24 }
  0x3e   :  { %v121_v31 = vpop.eup %120 }
  0x3f   :  { %v123_v34 = vpop.eup %122  ;;  %v81_v35 = vmul.f32 %v121_v31, %v77_v22 }
  0x40   :  { %v82_v36 = vmul.f32 %v123_v34, %v78_v24 }
  0x41   :  { %v83_v38 = vsub.f32 2.0, %v81_v35 }
  0x42   :  { %v84_v40 = vsub.f32 2.0, %v82_v36 }
  0x43   :  { %v85_v41 = vmul.f32 %v121_v31, %v83_v38 }
  0x44   :  { %v86_v42 = vmul.f32 %v123_v34, %v84_v40 }
  0x45   :  { %v87_v43 = vmul.f32 %v85_v41, %v60_v37 }
  0x46   :  { %v88_v44 = vmul.f32 %v86_v42, %v61_v39 }
  0x47   :  { %89 = vst [vmem:[#allocation7] sm:$0xff] %v87_v43 }
  0x48   :  { %90 = vst [vmem:[#allocation7 + $0x8] sm:$0xff] %v88_v44 }
  0x49   :  { %167 = shalt.err (!%p164_p1)
}
  0x4a   :  { %s168_s15 = scalar_lea.hbm %s248_s2, 256 }
  0x4b   :  { %p169_p2 = scmp.ne.s32.totalorder %s248_s2, %s168_s15  ;;  %p172_p3 = scmp.lt.u32.totalorder %s168_s15, %s248_s2 }
  0x4d   :  { %p174_p4 = pnand %p172_p3, %p169_p2 }
  0x4f   :  { %177 = shalt.err (!%p174_p4)
}
  0x50   :  { %102 = dma.vmem_to_hbm [thread:$0]  %s97_s11, 256, %s248_s2, [#allocation4], %s186_s0, %s186_s0, %s187_s29  }
  0x51   :  { %182 = dma.done.wait [#allocation4], 256  }
  0x52   :  { %183 = vsyncadd [#allocation4], 4294967040 }
  0x53   :  { %106 = vsyncpa [#allocation3], 1 }
  0x54   :  { %107 = vsyncpa [#allocation4], 1 }
  0x55   :  { %108 = vsyncpa [#allocation5], 1 }

</bundles_post_ra>
